<compile_context>
chip_gen: v7x
topology: tpu7x:2x2x1
jax: 0.10.0
libtpu: 0.0.40
codegen_flags: <defaults>
</compile_context>

<pallas_src>
import functools

import jax
import jax.numpy as jnp
from jax.experimental import pallas as pl
from jax.experimental.pallas import tpu as pltpu

EPS = 1e-6
_LANE_TILE_CAP = 2048  # lane-axis tile (multiple of 128)


# ---------------------------------------------------------------------------
# Glue: unfold / fold (nn.Unfold / nn.Fold equivalents), pure data movement.
# ---------------------------------------------------------------------------
def _unfold(x, kern, stride):
    # x: (B, C, H, W) -> patches (B, C, K, L), K = kh*kw, L = oh*ow (row-major)
    B, C, H, W = x.shape
    kh, kw = kern
    sh, sw = stride
    oh = (H - kh) // sh + 1
    ow = (W - kw) // sw + 1
    if (sh, sw) == (kh, kw):
        # Non-overlapping fast path: single reshape + transpose.
        xc = x[:, :, :oh * kh, :ow * kw]
        p = xc.reshape(B, C, oh, kh, ow, kw)
        p = jnp.transpose(p, (0, 1, 3, 5, 2, 4)).reshape(B, C, kh * kw, oh * ow)
        return p, oh, ow
    cols = []
    for p in range(kh):
        for q in range(kw):
            sl = x[:, :, p:p + sh * (oh - 1) + 1:sh, q:q + sw * (ow - 1) + 1:sw]
            cols.append(sl.reshape(B, C, 1, oh * ow))
    return jnp.concatenate(cols, axis=2), oh, ow


def _fold(patches, out_hw, kern, stride):
    # patches: (B, C, K, L) -> (B, C, H, W), summing overlapping contributions
    B, C, K, L = patches.shape
    H, W = out_hw
    kh, kw = kern
    sh, sw = stride
    oh = (H - kh) // sh + 1
    ow = (W - kw) // sw + 1
    out = jnp.zeros((B, C, H, W), patches.dtype)
    p6 = patches.reshape(B, C, kh, kw, oh, ow)
    for p in range(kh):
        for q in range(kw):
            out = out.at[:, :, p:p + sh * (oh - 1) + 1:sh,
                         q:q + sw * (ow - 1) + 1:sw].add(p6[:, :, p, q])
    return out


# ---------------------------------------------------------------------------
# Fused kernel. Layouts: patches (C1*K, TN), channel slabs (C, TN);
# lane axis = padded batch*spatial.  All weight folding done in the wrapper.
# ---------------------------------------------------------------------------
def _fused_residual_kernel(rot_ref, abs_ref, x2r_ref, x2a_ref,
                           wrot_ref, wabs_ref, wg1_ref, wg2_ref, wn1_ref,
                           orot_ref, oabs_ref):
    f32 = jnp.float32

    # Rotation path: fully linear -> one fused MXU matmul + residual matmul.
    orot_ref[...] = (
        jnp.dot(wrot_ref[...], rot_ref[...], preferred_element_type=f32)
        + jnp.dot(wg2_ref[...], x2r_ref[...], preferred_element_type=f32))

    # Magnitude path: log -> matmul -> exp -> log -> matmul -> exp.
    log_in = jnp.log(abs_ref[...] + wn1_ref[...] + EPS)               # (CK, TN)
    conv_abs = jnp.exp(jnp.dot(wabs_ref[...], log_in,
                               preferred_element_type=f32))           # (C1, TN)
    log_mix = (
        jnp.dot(wg1_ref[...], jnp.log(conv_abs + EPS),
                preferred_element_type=f32)
        + jnp.dot(wg2_ref[...], jnp.log(x2a_ref[...] + EPS),
                  preferred_element_type=f32))                        # (O, TN)
    oabs_ref[...] = jnp.exp(log_mix)


# ---------------------------------------------------------------------------
# Wrapper reproducing ResidualLayer.forward
# ---------------------------------------------------------------------------
@functools.partial(jax.jit, static_argnames=("kern", "stride"))
def residual_layer_forward(x1, x2, params, kern, stride):
    f32 = jnp.float32
    wmr = params["group_wmr"].astype(f32)
    wma = params["group_wma"].astype(f32)
    w1 = params["angle_w1"].astype(f32)
    w2 = params["angle_w2"].astype(f32)
    w = params["res_w"].astype(f32)

    B, _, C1, H, W = x1.shape
    kh, kw = kern
    sh, sw = stride
    K = kh * kw
    CK = C1 * K
    oh = (H - kh) // sh + 1
    ow = (W - kw) // sw + 1
    L = oh * ow
    C2 = x2.shape[2]
    Cout1 = w2.shape[0]        # == C1 for ResidualLayer
    O = w.shape[0]

    # --- Hoisted weight normalizations (parameter-only, computed once) ------
    wn2 = wmr / jnp.sum(wmr * wmr)                         # weightNormalize2(wmr)
    wn1 = (wma * wma) / jnp.sum(wma * wma)                 # weightNormalize1(wma)
    w1sq, w2sq, wsq = w1 * w1, w2 * w2, w * w
    w1g = w1sq / jnp.sum(w1sq)                             # rot path (global norm)
    w1r = w1sq / jnp.sum(w1sq, axis=1, keepdims=True)      # abs path (per-row norm)
    w2g = w2sq / jnp.sum(w2sq)
    w2r = w2sq / jnp.sum(w2sq, axis=1, keepdims=True)
    wg = wsq / jnp.sum(wsq)
    wg1, wg2 = wg[:, :Cout1], wg[:, Cout1:]

    # --- Unfold x1 into patches (pure data movement, XLA glue) --------------
    rot_p, _, _ = _unfold(x1[:, 0].astype(f32), kern, stride)   # (B, C1, K, L)
    abs_p, _, _ = _unfold(x1[:, 1].astype(f32), kern, stride)

    non_overlapping = (sh >= kh) and (sw >= kw)
    if non_overlapping:
        # Fold followed by Unfold is the identity on the patch tensor, so the
        # group pre-scaling folds straight into the combined weight matrices.
        rot_scale = wn2
        wn1_flat = wn1.reshape(CK, 1)
    else:
        # TODO(synk): overlapping windows — the Fold/re-Unfold accumulation is
        # done as XLA glue; group pre-scaling applied there, neutralized below.
        rot_p = rot_p * wn2[None, :, :, None]
        abs_p = abs_p + wn1[None, :, :, None]
        rot_p = _unfold(_fold(rot_p, (H, W), kern, stride), kern, stride)[0]
        abs_p = _unfold(_fold(abs_p, (H, W), kern, stride), kern, stride)[0]
        rot_scale = jnp.ones_like(wn2)
        wn1_flat = jnp.zeros((CK, 1), f32)

    # --- Pre-fold the fully linear rotation path into ONE (O, C1*K) matrix --
    #   orot = wg1 @ w2g @ blockdiag(rot_scale * w1g) @ rot_flat + wg2 @ x2r
    eye_c1 = jnp.eye(C1, dtype=f32)
    m1_rot = jnp.einsum('cd,dk->cdk', eye_c1, rot_scale * w1g).reshape(C1, CK)
    w_rot = wg1 @ (w2g @ m1_rot)                           # (O, CK)
    # --- Same collapse for the first magnitude stage (acts on log values) ---
    m1_abs = jnp.einsum('cd,dk->cdk', eye_c1, w1r).reshape(C1, CK)
    w_abs = w2r @ m1_abs                                   # (Cout1, CK)

    # --- Lane-dense layout: (channels*kern, batch*spatial), pad to tile -----
    N = B * L
    lane_tile = min(_LANE_TILE_CAP, ((N + 127) // 128) * 128)
    Np = ((N + lane_tile - 1) // lane_tile) * lane_tile
    pad = Np - N

    rot_l = jnp.pad(jnp.transpose(rot_p, (1, 2, 0, 3)).reshape(CK, N),
                    ((0, 0), (0, pad)))
    abs_l = jnp.pad(jnp.transpose(abs_p, (1, 2, 0, 3)).reshape(CK, N),
                    ((0, 0), (0, pad)))
    x2r = jnp.pad(jnp.transpose(x2[:, 0].astype(f32).reshape(B, C2, L),
                                (1, 0, 2)).reshape(C2, N), ((0, 0), (0, pad)))
    x2a = jnp.pad(jnp.transpose(x2[:, 1].astype(f32).reshape(B, C2, L),
                                (1, 0, 2)).reshape(C2, N), ((0, 0), (0, pad)))

    def lane_spec(rows):
        return pl.BlockSpec((rows, lane_tile), lambda n: (0, n))

    def full_spec(shape):
        return pl.BlockSpec(shape, lambda n: (0, 0))

    out_rot, out_abs = pl.pallas_call(
        _fused_residual_kernel,
        grid_spec=pltpu.PrefetchScalarGridSpec(
            num_scalar_prefetch=0,
            grid=(Np // lane_tile,),
            in_specs=[
                lane_spec(CK), lane_spec(CK), lane_spec(C2), lane_spec(C2),
                full_spec((O, CK)), full_spec((Cout1, CK)),
                full_spec((O, Cout1)), full_spec((O, C2)),
                full_spec((CK, 1)),
            ],
            out_specs=[lane_spec(O), lane_spec(O)],
        ),
        out_shape=(jax.ShapeDtypeStruct((O, Np), f32),
                   jax.ShapeDtypeStruct((O, Np), f32)),
        compiler_params=pltpu.CompilerParams(
            dimension_semantics=("parallel",)),
    )(rot_l, abs_l, x2r, x2a, w_rot, w_abs, wg1, wg2, wn1_flat)

    def lanes_to_out(o):                         # (O, Np) -> (B, O, oh, ow)
        o = o[:, :N].reshape(O, B, L)
        return jnp.transpose(o, (1, 0, 2)).reshape(B, O, oh, ow)

    return jnp.stack([lanes_to_out(out_rot), lanes_to_out(out_abs)],
                     axis=1)                     # (B, 2, O, oh, ow)


# ---------------------------------------------------------------------------
# Pure-JAX reference (follows the PyTorch forward op-for-op) for validation.
# ---------------------------------------------------------------------------
def _reference_forward(x1, x2, params, kern, stride):
    wmr, wma = params["group_wmr"], params["group_wma"]
    w1, w2 = params["angle_w1"], params["angle_w2"]
    w = params["res_w"]
    B, _, C1, H, W = x1.shape

    rot_p, oh, ow = _unfold(x1[:, 0], kern, stride)          # (B, C1, K, L)
    abs_p, _, _ = _unfold(x1[:, 1], kern, stride)
    wn2 = wmr / jnp.sum(wmr * wmr)
    wn1 = (wma * wma) / jnp.sum(wma * wma)
    in_rot = rot_p * wn2[None, :, :, None]
    in_abs = abs_p + wn1[None, :, :, None]
    in_rot = _unfold(_fold(in_rot, (H, W), kern, stride), kern, stride)[0]
    in_abs = _unfold(_fold(in_abs, (H, W), kern, stride), kern, stride)[0]

    w1sq, w2sq = w1 * w1, w2 * w2
    w1g = w1sq / jnp.sum(w1sq)
    w1r = w1sq / jnp.sum(w1sq, axis=1, keepdims=True)
    w2g = w2sq / jnp.sum(w2sq)
    w2r = w2sq / jnp.sum(w2sq, axis=1, keepdims=True)

    r1 = jnp.sum(in_rot * w1g[None, :, :, None], axis=2)      # (B, C1, L)
    conv_rot = jnp.einsum('oc,bcl->bol', w2g, r1)             # (B, Cout1, L)
    a1 = jnp.sum(jnp.log(in_abs + EPS) * w1r[None, :, :, None], axis=2)
    conv_abs = jnp.exp(jnp.einsum('oc,bcl->bol', w2r, a1))

    L = oh * ow
    x2r = x2[:, 0].reshape(B, -1, L)
    x2a = x2[:, 1].reshape(B, -1, L)
    cat_rot = jnp.concatenate([conv_rot, x2r], axis=1)
    cat_abs = jnp.concatenate([conv_abs, x2a], axis=1)
    wsq = w * w
    wg = wsq / jnp.sum(wsq)
    out_rot = jnp.einsum('oc,bcl->bol', wg, cat_rot)
    out_abs = jnp.exp(jnp.einsum('oc,bcl->bol', wg, jnp.log(cat_abs + EPS)))
    out = jnp.stack([out_rot, out_abs], axis=1)
    return out.reshape(B, 2, -1, oh, ow)


if __name__ == "__main__":
    # Module config: ResidualLayer(in_channel1=4, in_channel2=4, out_channel=4,
    #                              kern_size=(2,2), stride=(2,2))
    B, C1, C2, O = 2, 4, 4, 4
    kern, stride = (2, 2), (2, 2)
    H = W = 8
    K = kern[0] * kern[1]
    oh = (H - kern[0]) // stride[0] + 1
    ow = (W - kern[1]) // stride[1] + 1

    key = jax.random.PRNGKey(0)
    ks = jax.random.split(key, 7)

    # Deterministic parameters (torch.rand equivalents).
    params = {
        "group_wmr": jax.random.uniform(ks[0], (C1, K), jnp.float32),
        "group_wma": jax.random.uniform(ks[1], (C1, K), jnp.float32),
        "angle_w1": jax.random.uniform(ks[2], (C1, K), jnp.float32),
        "angle_w2": jax.random.uniform(ks[3], (C1, C1), jnp.float32),
        "res_w": jax.random.uniform(ks[4], (O, C1 + C2), jnp.float32),
    }

    # Inputs: x1 (B, 2, C1, H, W); x2 (B, 2, C2, oh, ow) — positive magnitudes.
    x1 = jax.random.uniform(ks[5], (B, 2, C1, H, W), jnp.float32, 0.05, 1.0)
    x2 = jax.random.uniform(ks[6], (B, 2, C2, oh, ow), jnp.float32, 0.05, 1.0)

    out = residual_layer_forward(x1, x2, params, kern, stride)
    out = jax.block_until_ready(out)

    assert out.shape == (B, 2, O, oh, ow), out.shape
    assert bool(jnp.all(jnp.isfinite(out)))

    ref = _reference_forward(x1, x2, params, kern, stride)
    max_err = float(jnp.max(jnp.abs(out - ref)))
    assert jnp.allclose(out, ref, rtol=1e-4, atol=1e-5), max_err

    print("KERNEL_OK")
</pallas_src>

<mosaic_0001>
module attributes {stable_mosaic.version = 11 : i64} {
  func.func @_fused_residual_kernel(%arg0: i32, %arg1: memref<16x128xf32, #tpu.memory_space<vmem>>, %arg2: memref<16x128xf32, #tpu.memory_space<vmem>>, %arg3: memref<4x128xf32, #tpu.memory_space<vmem>>, %arg4: memref<4x128xf32, #tpu.memory_space<vmem>>, %arg5: memref<4x16xf32, #tpu.memory_space<vmem>>, %arg6: memref<4x16xf32, #tpu.memory_space<vmem>>, %arg7: memref<4x4xf32, #tpu.memory_space<vmem>>, %arg8: memref<4x4xf32, #tpu.memory_space<vmem>>, %arg9: memref<16x1xf32, #tpu.memory_space<vmem>>, %arg10: memref<4x128xf32, #tpu.memory_space<vmem>>, %arg11: memref<4x128xf32, #tpu.memory_space<vmem>>) attributes {dimension_semantics = [#tpu.dimension_semantics<parallel>], iteration_bounds = array<i64: 1>, scalar_prefetch = 0 : i64, scratch_operands = 0 : i64, tpu.core_type = #tpu.core_type<tc>, window_params = [{transform_indices = @transform_0, window_bounds = array<i64: 16, 128>}, {transform_indices = @transform_1, window_bounds = array<i64: 16, 128>}, {transform_indices = @transform_2, window_bounds = array<i64: 4, 128>}, {transform_indices = @transform_3, window_bounds = array<i64: 4, 128>}, {pipeline_mode = #tpu.pipeline_mode<synchronous>, transform_indices = @transform_4, window_bounds = array<i64: 4, 16>}, {pipeline_mode = #tpu.pipeline_mode<synchronous>, transform_indices = @transform_5, window_bounds = array<i64: 4, 16>}, {pipeline_mode = #tpu.pipeline_mode<synchronous>, transform_indices = @transform_6, window_bounds = array<i64: 4, 4>}, {pipeline_mode = #tpu.pipeline_mode<synchronous>, transform_indices = @transform_7, window_bounds = array<i64: 4, 4>}, {pipeline_mode = #tpu.pipeline_mode<synchronous>, transform_indices = @transform_8, window_bounds = array<i64: 16, 1>}, {transform_indices = @transform_9, window_bounds = array<i64: 4, 128>}, {transform_indices = @transform_10, window_bounds = array<i64: 4, 128>}]} {
    %c0 = arith.constant 0 : index
    %c0_0 = arith.constant 0 : index
    %0 = vector.load %arg5[%c0, %c0_0] : memref<4x16xf32, #tpu.memory_space<vmem>>, vector<4x16xf32>
    %c0_1 = arith.constant 0 : index
    %c0_2 = arith.constant 0 : index
    %1 = vector.load %arg1[%c0_1, %c0_2] : memref<16x128xf32, #tpu.memory_space<vmem>>, vector<16x128xf32>
    %cst = arith.constant dense<0.000000e+00> : vector<4x128xf32>
    %2 = tpu.matmul %0, %1, %cst {dimension_numbers = #tpu.dot_dimension_numbers<[1], [0], [0], [1], [0, 0, 1, 1], [], []>} : vector<4x16xf32>, vector<16x128xf32>, vector<4x128xf32> -> vector<4x128xf32>
    %c0_3 = arith.constant 0 : index
    %c0_4 = arith.constant 0 : index
    %3 = vector.load %arg8[%c0_3, %c0_4] : memref<4x4xf32, #tpu.memory_space<vmem>>, vector<4x4xf32>
    %c0_5 = arith.constant 0 : index
    %c0_6 = arith.constant 0 : index
    %4 = vector.load %arg3[%c0_5, %c0_6] : memref<4x128xf32, #tpu.memory_space<vmem>>, vector<4x128xf32>
    %cst_7 = arith.constant dense<0.000000e+00> : vector<4x128xf32>
    %5 = tpu.matmul %3, %4, %cst_7 {dimension_numbers = #tpu.dot_dimension_numbers<[1], [0], [0], [1], [0, 0, 1, 1], [], []>} : vector<4x4xf32>, vector<4x128xf32>, vector<4x128xf32> -> vector<4x128xf32>
    %6 = arith.addf %2, %5 : vector<4x128xf32>
    %c0_8 = arith.constant 0 : index
    %c0_9 = arith.constant 0 : index
    %7 = vector.load %arg10[%c0_8, %c0_9] : memref<4x128xf32, #tpu.memory_space<vmem>>, vector<4x128xf32>
    tpu.vector_store %arg10[%c0_8, %c0_9], %6 {strides = array<i32>} : memref<4x128xf32, #tpu.memory_space<vmem>>, vector<4x128xf32>,
    %c0_10 = arith.constant 0 : index
    %c0_11 = arith.constant 0 : index
    %8 = vector.load %arg2[%c0_10, %c0_11] : memref<16x128xf32, #tpu.memory_space<vmem>>, vector<16x128xf32>
    %c0_12 = arith.constant 0 : index
    %c0_13 = arith.constant 0 : index
    %9 = vector.load %arg9[%c0_12, %c0_13] : memref<16x1xf32, #tpu.memory_space<vmem>>, vector<16x1xf32>
    %10 = vector.broadcast %9 : vector<16x1xf32> to vector<16x128xf32>
    %11 = arith.addf %8, %10 : vector<16x128xf32>
    %cst_14 = arith.constant 9.99999997E-7 : f32
    %12 = vector.broadcast %cst_14 : f32 to vector<16x128xf32>
    %13 = arith.addf %11, %12 : vector<16x128xf32>
    %14 = math.log %13 : vector<16x128xf32>
    %c0_15 = arith.constant 0 : index
    %c0_16 = arith.constant 0 : index
    %15 = vector.load %arg6[%c0_15, %c0_16] : memref<4x16xf32, #tpu.memory_space<vmem>>, vector<4x16xf32>
    %cst_17 = arith.constant dense<0.000000e+00> : vector<4x128xf32>
    %16 = tpu.matmul %15, %14, %cst_17 {dimension_numbers = #tpu.dot_dimension_numbers<[1], [0], [0], [1], [0, 0, 1, 1], [], []>} : vector<4x16xf32>, vector<16x128xf32>, vector<4x128xf32> -> vector<4x128xf32>
    %17 = math.exp %16 : vector<4x128xf32>
    %c0_18 = arith.constant 0 : index
    %c0_19 = arith.constant 0 : index
    %18 = vector.load %arg7[%c0_18, %c0_19] : memref<4x4xf32, #tpu.memory_space<vmem>>, vector<4x4xf32>
    %cst_20 = arith.constant 9.99999997E-7 : f32
    %19 = vector.broadcast %cst_20 : f32 to vector<4x128xf32>
    %20 = arith.addf %17, %19 : vector<4x128xf32>
    %21 = math.log %20 : vector<4x128xf32>
    %cst_21 = arith.constant dense<0.000000e+00> : vector<4x128xf32>
    %22 = tpu.matmul %18, %21, %cst_21 {dimension_numbers = #tpu.dot_dimension_numbers<[1], [0], [0], [1], [0, 0, 1, 1], [], []>} : vector<4x4xf32>, vector<4x128xf32>, vector<4x128xf32> -> vector<4x128xf32>
    %c0_22 = arith.constant 0 : index
    %c0_23 = arith.constant 0 : index
    %23 = vector.load %arg8[%c0_22, %c0_23] : memref<4x4xf32, #tpu.memory_space<vmem>>, vector<4x4xf32>
    %c0_24 = arith.constant 0 : index
    %c0_25 = arith.constant 0 : index
    %24 = vector.load %arg4[%c0_24, %c0_25] : memref<4x128xf32, #tpu.memory_space<vmem>>, vector<4x128xf32>
    %cst_26 = arith.constant 9.99999997E-7 : f32
    %25 = vector.broadcast %cst_26 : f32 to vector<4x128xf32>
    %26 = arith.addf %24, %25 : vector<4x128xf32>
    %27 = math.log %26 : vector<4x128xf32>
    %cst_27 = arith.constant dense<0.000000e+00> : vector<4x128xf32>
    %28 = tpu.matmul %23, %27, %cst_27 {dimension_numbers = #tpu.dot_dimension_numbers<[1], [0], [0], [1], [0, 0, 1, 1], [], []>} : vector<4x4xf32>, vector<4x128xf32>, vector<4x128xf32> -> vector<4x128xf32>
    %29 = arith.addf %22, %28 : vector<4x128xf32>
    %30 = math.exp %29 : vector<4x128xf32>
    %c0_28 = arith.constant 0 : index
    %c0_29 = arith.constant 0 : index
    %31 = vector.load %arg11[%c0_28, %c0_29] : memref<4x128xf32, #tpu.memory_space<vmem>>, vector<4x128xf32>
    tpu.vector_store %arg11[%c0_28, %c0_29], %30 {strides = array<i32>} : memref<4x128xf32, #tpu.memory_space<vmem>>, vector<4x128xf32>,
    return
  }
  func.func @transform_0(%arg0: i32) -> (i32, i32) {
    %c0_i32 = arith.constant 0 : i32
    %c0_i32_0 = arith.constant 0 : i32
    return %c0_i32, %arg0 : i32, i32
  }
  func.func @transform_1(%arg0: i32) -> (i32, i32) {
    %c0_i32 = arith.constant 0 : i32
    %c0_i32_0 = arith.constant 0 : i32
    return %c0_i32, %arg0 : i32, i32
  }
  func.func @transform_2(%arg0: i32) -> (i32, i32) {
    %c0_i32 = arith.constant 0 : i32
    %c0_i32_0 = arith.constant 0 : i32
    return %c0_i32, %arg0 : i32, i32
  }
  func.func @transform_3(%arg0: i32) -> (i32, i32) {
    %c0_i32 = arith.constant 0 : i32
    %c0_i32_0 = arith.constant 0 : i32
    return %c0_i32, %arg0 : i32, i32
  }
  func.func @transform_4(%arg0: i32) -> (i32, i32) {
    %c0_i32 = arith.constant 0 : i32
    %c0_i32_0 = arith.constant 0 : i32
    %c0_i32_1 = arith.constant 0 : i32
    return %c0_i32, %c0_i32_0 : i32, i32
  }
  func.func @transform_5(%arg0: i32) -> (i32, i32) {
    %c0_i32 = arith.constant 0 : i32
    %c0_i32_0 = arith.constant 0 : i32
    %c0_i32_1 = arith.constant 0 : i32
    return %c0_i32, %c0_i32_0 : i32, i32
  }
  func.func @transform_6(%arg0: i32) -> (i32, i32) {
    %c0_i32 = arith.constant 0 : i32
    %c0_i32_0 = arith.constant 0 : i32
    %c0_i32_1 = arith.constant 0 : i32
    return %c0_i32, %c0_i32_0 : i32, i32
  }
  func.func @transform_7(%arg0: i32) -> (i32, i32) {
    %c0_i32 = arith.constant 0 : i32
    %c0_i32_0 = arith.constant 0 : i32
    %c0_i32_1 = arith.constant 0 : i32
    return %c0_i32, %c0_i32_0 : i32, i32
  }
  func.func @transform_8(%arg0: i32) -> (i32, i32) {
    %c0_i32 = arith.constant 0 : i32
    %c0_i32_0 = arith.constant 0 : i32
    %c0_i32_1 = arith.constant 0 : i32
    return %c0_i32, %c0_i32_0 : i32, i32
  }
  func.func @transform_9(%arg0: i32) -> (i32, i32) {
    %c0_i32 = arith.constant 0 : i32
    %c0_i32_0 = arith.constant 0 : i32
    return %c0_i32, %arg0 : i32, i32
  }
  func.func @transform_10(%arg0: i32) -> (i32, i32) {
    %c0_i32 = arith.constant 0 : i32
    %c0_i32_0 = arith.constant 0 : i32
    return %c0_i32, %arg0 : i32, i32
  }
}

</mosaic_0001>

<bundles_post_ra>
// kernel: squeeze.6
= control target key start
LH: loop header
LB: loop body
LE: loop exit
PB: predicated region body
PF: predicated region fallthrough
CT: control target
= control target key end

     0   :  { %vm42_vm0 = vcmask 1047556   ;;  %vm44_vm1 = vcmask 31744   ;;  %s113_s22 = smov 4   ;;  %s114_s23 = smov 8   ;;  %vm56_vm2 = vcmask 130144   ;;  %vm68_vm3 = vcmask 97344   ;;  %s161_s0 = inlined_call_operand.vmem [shape: f32[2,1,4,4,4], index: 0, kind: input, shape index: {}]   ;;  %s162_s1 = inlined_call_operand.vmem [shape: f32[2,4,16], index: 1, kind: output, shape index: {}]  }
   0x1   :  { %v101_v0 = vld [vmem:[%s161_s0 + $0x1c] sm:$0xf]  ;;  %v102_v1 = vld [vmem:[%s161_s0 + $0x18] sm:$0xf]  ;;  %v103_v2 = vld [vmem:[%s161_s0 + $0x14] sm:$0xf] }
   0x2   :  { %8 = vst [vmem:[#allocation1 + $0x38] sm:$0xf] %v101_v0  ;;  %13 = vst [vmem:[#allocation1 + $0x30] sm:$0xf] %v102_v1  ;;  %v104_v3 = vld [vmem:[%s161_s0 + $0x10] sm:$0xf] }
   0x3   :  { %18 = vst [vmem:[#allocation1 + $0x28] sm:$0xf] %v103_v2  ;;  %v105_v4 = vld [vmem:[%s161_s0 + $0xc] sm:$0xf]  ;;  %v106_v5 = vld [vmem:[%s161_s0 + $0x8] sm:$0xf] }
   0x4   :  { %23 = vst [vmem:[#allocation1 + $0x20] sm:$0xf] %v104_v3  ;;  %28 = vst [vmem:[#allocation1 + $0x18] sm:$0xf] %v105_v4  ;;  %v107_v6 = vld [vmem:[%s161_s0 + $0x4] sm:$0xf] }
   0x5   :  { %33 = vst [vmem:[#allocation1 + $0x10] sm:$0xf] %v106_v5  ;;  %v38_v7 = vld [vmem:[%s161_s0] sm:$0xf]  ;;  %37 = vst [vmem:[#allocation1 + $0x8] sm:$0xf] %v107_v6 }
   0x6   :  { %39 = vst [vmem:[#allocation1] sm:$0xf] %v38_v7  ;;  %s112_s0 = smov 12   ;;  %vm80_vm4 = vcmask 64544  }
   0xb   :  { %v51_v8 = vld [vmem:[#allocation1 + $0x3] ss:$8 sm:$0xf0]   ;;  %v63_v9 = vld [vmem:[#allocation1 + $0x2] ss:$8 sm:$0xf0]  }
   0xc   :  { %v75_v14 = vld [vmem:[#allocation1 + $0x1] ss:$8 sm:$0xf0]   ;;  %v41_v17 = vld [vmem:[#allocation1] ss:$8 sm:$0xf0]  }
   0xd   :  { %v49_v10 = vld [vmem:[#allocation1 + $0x3] ss:$8 sm:$0xf]   ;;  %v61_v11 = vld [vmem:[#allocation1 + $0x2] ss:$8 sm:$0xf]  }
   0xe   :  { %v53_v12 = vsel %vm42_vm0, %v51_v8, %v49_v10  ;;  %v73_v13 = vld [vmem:[#allocation1 + $0x1] ss:$8 sm:$0xf]   ;;  %v40_v16 = vld [vmem:[#allocation1] ss:$8 sm:$0xf]   ;;  %v65_v18 = vsel %vm42_vm0, %v63_v9, %v61_v11 }
   0xf   :  { %54 = vrot.lane.b32.xlu0 %v53_v12, %s112_s0  ;;  %v77_v15 = vsel %vm42_vm0, %v75_v14, %v73_v13  ;;  %v43_v19 = vsel %vm42_vm0, %v41_v17, %v40_v16 }
  0x10   :  { %78 = vrot.lane.b32.xlu1 %v77_v15, %s113_s22  ;;  %45 = vst.msk [vmem:[#allocation0] sm:$0xf] %vm44_vm1, %v43_v19   ;;  %47 = vst.msk [vmem:[#allocation0 + $0x4] sm:$0xf0] %vm44_vm1, %v43_v19  }
  0x13   :  { %66 = vrot.lane.b32.xlu0 %v65_v18, %s114_s23 }
  0x81   :  { %v55_v20 = vpop.permute.xlu0 %54  }
  0x82   :  { %57 = vst.msk [vmem:[#allocation0] sm:$0xf] %vm56_vm2, %v55_v20   ;;  %59 = vst.msk [vmem:[#allocation0 + $0x4] sm:$0xf0] %vm56_vm2, %v55_v20   ;;  %v79_v21 = vpop.permute.xlu1 %78  }
  0x85   :  { %v67_v22 = vpop.permute.xlu0 %66  }
  0x86   :  { %69 = vst.msk [vmem:[#allocation0] sm:$0xf] %vm68_vm3, %v67_v22   ;;  %71 = vst.msk [vmem:[#allocation0 + $0x4] sm:$0xf0] %vm68_vm3, %v67_v22  }
  0x87   :  { %81 = vst.msk [vmem:[#allocation0] sm:$0xf] %vm80_vm4, %v79_v21   ;;  %83 = vst.msk [vmem:[#allocation0 + $0x4] sm:$0xf0] %vm80_vm4, %v79_v21  }
  0x8e   :  { %v87_v23 = vld [vmem:[#allocation0] sm:$0xf]  ;;  %v91_v24 = vld [vmem:[#allocation0 + $0x8] sm:$0xf] }
  0x8f   :  { %89 = vst [vmem:[%s162_s1] sm:$0xf] %v87_v23  ;;  %108 = vst [vmem:[%s162_s1 + $0x4] sm:$0xf] %v91_v24 }

// kernel: residual_layer_forward.1
= control target key start
LH: loop header
LB: loop body
LE: loop exit
PB: predicated region body
PF: predicated region fallthrough
CT: control target
= control target key end

     0   :  { %v538_v0 = vmov 0   ;;  %v539_v3 = vmov 0.0   ;;  %vm43_vm0 = vcmask 1043456   ;;  %vm39_vm1 = vcmask 31744   ;;  %s655_s8 = inlined_call_operand.vmem [shape: f32[16,1], index: 8, kind: input, shape index: {}]   ;;  %s656_s2 = inlined_call_operand.vmem [shape: f32[4,128], index: 2, kind: input, shape index: {}]   ;;  %s657_s7 = inlined_call_operand.vmem [shape: f32[4,4], index: 7, kind: input, shape index: {}]   ;;  %s658_s0 = inlined_call_operand.vmem [shape: f32[16,128], index: 0, kind: input, shape index: {}]   ;;  %s659_s4 = inlined_call_operand.vmem [shape: f32[4,16], index: 4, kind: input, shape index: {}]   ;;  %s660_s1 = inlined_call_operand.vmem [shape: f32[16,128], index: 1, kind: input, shape index: {}]   ;;  %s661_s5 = inlined_call_operand.vmem [shape: f32[4,16], index: 5, kind: input, shape index: {}]   ;;  %s662_s9 = inlined_call_operand.vmem [shape: f32[4,128], index: 9, kind: output, shape index: {0}]   ;;  %s663_s3 = inlined_call_operand.vmem [shape: f32[4,128], index: 3, kind: input, shape index: {}]   ;;  %s664_s6 = inlined_call_operand.vmem [shape: f32[4,4], index: 6, kind: input, shape index: {}]   ;;  %s665_s10 = inlined_call_operand.vmem [shape: f32[4,128], index: 10, kind: output, shape index: {1}]  }
   0x1   :  { %525 = vset.pattern.permute.xlu0 %v538_v0  ;;  %v194_v1 = vld [vmem:[%s655_s8] sm:$0xff]  ;;  %v195_v2 = vld [vmem:[%s655_s8 + $0x8] sm:$0xff]  ;;  %482 = vmatprep.subr.mxu0 %v539_v3  ;;  %vm540_vm2 = vmmov 0   ;;  %v541_v9 = vmov 0.0|0.0   ;;  %vm117_vm3 = vcmask 130048  }
   0x2   :  { %198 = vperm.xlu0 %525, %v194_v1   ;;  %v38_v4 = vld [vmem:[%s656_s2] sm:$0xf]  ;;  %501 = vmatprep.subr.mxu1 %v539_v3  ;;  %v36_v7 = vld [vmem:[%s658_s0 + $0x8] sm:$0xff] }
   0x3   :  { %483 = vmatpush3.msk.msra.mxu0 %vm43_vm0, %v38_v4  ;;  %v37_v5 = vld [vmem:[%s657_s7] sm:$0xf]  ;;  %484 = vmatprep.mubr.msk.f32.mxu0 %vm540_vm2, %v539_v3  ;;  %v193_v14 = vld [vmem:[%s660_s1 + $0x8] sm:$0xff] }
   0x4   :  { %503 = vmatprep.mubr.msk.f32.mxu1 %vm540_vm2, %v539_v3  ;;  %485 = vmatmul.mubr.msk.f32.vlgmr.msra.gmra.mrb[0].mxu0 %vm39_vm1, %v37_v5  ;;  %v35_v6 = vld [vmem:[%s658_s0] sm:$0xff] }
   0x5   :  { %491 = vmatprep.mubr.msk.f32.mxu0 %vm540_vm2, %v539_v3  ;;  %v512_v8 = vpack.c.bf16 %v36_v7, %v35_v6  ;;  %511 = vmatprep.subr.bf16.mxu0 %v541_v9  ;;  %v34_v10 = vld [vmem:[%s659_s4] sm:$0xf] }
   0x6   :  { %203 = vperm.xlu0 %525, %v195_v2   ;;  %v192_v11 = vld [vmem:[%s660_s1] sm:$0xff] }
   0x7   :  { %513 = vmatpush3.bf16.msra.mxu0 %v512_v8  ;;  %v214_v24 = vld [vmem:[%s661_s5] sm:$0xf] }
   0x8   :  { %514 = vmatprep.subr.bf16.mxu0 %v541_v9  ;;  %v295_v27 = vld [vmem:[%s663_s3] sm:$0xf] }
   0x9   :  { %v296_v28 = vadd.f32 1e-06, %v295_v27  ;;  %v294_v31 = vld [vmem:[%s657_s7] sm:$0xf] }
   0xa   :  { %v290_v39 = vld [vmem:[%s664_s6] sm:$0xf] }
   0xc   :  { %492 = vmatmul.mubr.msk.f32.vlgmr.msra.gmra.mrb[0].mxu0 %vm117_vm3, %v34_v10 }
   0xd   :  { %498 = vmatprep.mubr.msk.f32.mxu0 %vm540_vm2, %v539_v3 }
  0x81   :  { %v199_v12 = vpop.permute.xlu0 %198 }
  0x82   :  { %v206_v13 = vadd.f32 %v199_v12, %v192_v11 }
  0x84   :  { %v208_v15 = vadd.f32 1e-06, %v206_v13 }
  0x85   :  { %v204_v16 = vpop.permute.xlu0 %203 }
  0x86   :  { %v207_v17 = vadd.f32 %v204_v16, %v193_v14  ;;  %526 = vlog2.f32 %v208_v15 }
  0x88   :  { %v209_v18 = vadd.f32 1e-06, %v207_v17 }
  0x8a   :  { %528 = vlog2.f32 %v209_v18 }
  0x8b   :  { %530 = vlog2.f32 %v296_v28 }
  0x90   :  { %v527_v19 = vpop.eup %526 }
  0x91   :  { %v211_v21 = vmul.f32 0.6931472, %v527_v19 }
  0x94   :  { %v529_v20 = vpop.eup %528 }
  0x95   :  { %v213_v22 = vmul.f32 0.6931472, %v529_v20  ;;  %v531_v29 = vpop.eup %530 }
  0x96   :  { %v298_v30 = vmul.f32 0.6931472, %v531_v29 }
  0x97   :  { %v515_v23 = vpack.c.bf16 %v213_v22, %v211_v21 }
  0x98   :  { %502 = vmatpush3.msk.msra.mxu1 %vm43_vm0, %v298_v30 }
  0x99   :  { %516 = vmatpush3.bf16.msra.mxu0 %v515_v23  ;;  %504 = vmatmul.mubr.msk.f32.vlgmr.msra.gmra.mrb[0].mxu1 %vm39_vm1, %v294_v31 }
  0x9a   :  { %506 = vmatprep.subr.mxu1 %v539_v3  ;;  %508 = vmatprep.mubr.msk.f32.mxu1 %vm540_vm2, %v539_v3 }
  0x9c   :  { %499 = vmatmul.mubr.msk.f32.vlgmr.msra.gmra.mrb[2].mxu0 %vm117_vm3, %v214_v24 }
  0xdf   :  { %v187_v25 = vpop.f32.mrb[0].mxu0 }
  0xe0   :  { %191 = vst [vmem:[%s662_s9] sm:$0xf] %v187_v25  ;;  %v493_v26 = vpop.f32.mrb[1].mxu0 }
 0x16f   :  { %v284_v32 = vpop.f32.mrb[2].mxu0 }
 0x170   :  { %v288_v33 = vmul.f32 1.442695, %v284_v32  ;;  %v500_v34 = vpop.f32.mrb[3].mxu0 }
 0x172   :  { %532 = vpow2.f32 %v288_v33 }
 0x17c   :  { %v533_v35 = vpop.eup %532 }
 0x17d   :  { %v291_v36 = vadd.f32 1e-06, %v533_v35 }
 0x17f   :  { %534 = vlog2.f32 %v291_v36 }
 0x189   :  { %v535_v37 = vpop.eup %534 }
 0x18a   :  { %v293_v38 = vmul.f32 0.6931472, %v535_v37 }
 0x18c   :  { %507 = vmatpush3.msk.msra.mxu1 %vm43_vm0, %v293_v38 }
 0x18d   :  { %509 = vmatmul.mubr.msk.f32.vlgmr.msra.gmra.mrb[0].mxu1 %vm39_vm1, %v290_v39 }
 0x260   :  { %v447_v40 = vpop.f32.mrb[0].mxu1 }
 0x261   :  { %v451_v41 = vmul.f32 1.442695, %v447_v40  ;;  %v510_v42 = vpop.f32.mrb[1].mxu1 }
 0x263   :  { %536 = vpow2.f32 %v451_v41 }
 0x26d   :  { %v537_v43 = vpop.eup %536 }
 0x26e   :  { %453 = vst [vmem:[%s665_s10] sm:$0xf] %v537_v43 }

</bundles_post_ra>
